<compile_context>
chip_gen: v7x
topology: tpu7x:2x2x1
jax: 0.10.0
libtpu: 0.0.40
codegen_flags: <defaults>
</compile_context>

<pallas_src>
import jax
import jax.numpy as jnp
from jax.experimental import pallas as pl
from jax.experimental.pallas import tpu as pltpu

LANES = 128
H1, H2 = 8, 4                      # hidden sizes
# packed-parameter layout (f32, padded to 64)
W1_OFF, B1_OFF = 0, 8              # w1': (8,)            b1': (8,)
W2_OFF, B2_OFF = 16, 48            # w2': (8,4) row-major  b2': (4,)
W3_OFF, B3_OFF = 52, 56            # w3': (4,)             b3': (1,)
PACKED_LEN = 64


def mlp_kernel(p_ref, x_ref, o_ref):
    # x block: (tile_rows, 128) f32, batch samples are lane-dense.
    x = x_ref[...]

    # Fused layers 1+2: accumulators start at folded bias b2'; each
    # t1_j = tanh(x*w1'_j + b1'_j) is consumed immediately and dies.
    acc = [p_ref[B2_OFF + k] for k in range(H2)]          # scalars -> broadcast
    for j in range(H1):
        t = jnp.tanh(x * p_ref[W1_OFF + j] + p_ref[B1_OFF + j])
        for k in range(H2):
            acc[k] = acc[k] + t * p_ref[W2_OFF + j * H2 + k]

    # Layer 3: out = b3' + sum_k tanh(acc_k) * w3'_k   (no output sigmoid).
    out = p_ref[B3_OFF]
    for k in range(H2):
        out = out + jnp.tanh(acc[k]) * p_ref[W3_OFF + k]

    o_ref[...] = out.astype(o_ref.dtype)


def pack_params(params):
    """Pack the six parameter arrays into one f32 vector, folding the
    sigmoid affine constants (0.5 pre-scale and 0.5*t + 0.5 output affine)
    into the weights/biases.  Host-side, 57 scalars, one-time cost."""
    w1 = params["w1"].reshape(-1).astype(jnp.float32)     # (8,)
    b1 = params["b1"].reshape(-1).astype(jnp.float32)     # (8,)
    w2 = params["w2"].astype(jnp.float32)                 # (8, 4)
    b2 = params["b2"].reshape(-1).astype(jnp.float32)     # (4,)
    w3 = params["w3"].reshape(-1).astype(jnp.float32)     # (4,)
    b3 = params["b3"].reshape(-1).astype(jnp.float32)     # (1,)

    # Layer 1: tanh argument pre-scale.
    w1p = 0.5 * w1
    b1p = 0.5 * b1
    # Layer 2: absorb h1 = 0.5*t1 + 0.5 and layer-2's own 0.5 tanh pre-scale:
    #   0.5*z2_k = sum_j t1_j*(0.25*w2[j,k]) + (0.5*b2_k + 0.25*sum_j w2[j,k])
    w2p = 0.25 * w2
    b2p = 0.5 * b2 + 0.25 * jnp.sum(w2, axis=0)
    # Layer 3: absorb h2 = 0.5*t2 + 0.5 (no sigmoid on the output):
    #   out = sum_k t2_k*(0.5*w3[k]) + (b3 + 0.5*sum_k w3[k])
    w3p = 0.5 * w3
    b3p = (b3 + 0.5 * jnp.sum(w3)).reshape(-1)

    vec = jnp.concatenate([w1p, b1p, w2p.reshape(-1), b2p, w3p, b3p])
    return jnp.pad(vec, (0, PACKED_LEN - vec.shape[0]))


def mynet_forward(x, params, tile_rows_max=1024):
    """x: (N, 1) float32. params: dict of (in,out) weights and (1,out) biases."""
    n = x.shape[0]
    packed = pack_params(params)

    # Lane-dense batch layout: flat batch -> (rows, 128).
    rows = pl.cdiv(n, LANES)
    # Keep >= 2 grid blocks (v7x has 2 TensorCores on the "parallel" axis),
    # but never more than tile_rows_max rows per block; multiple of 8 sublanes.
    half_rows = ((pl.cdiv(rows, 2) + 7) // 8) * 8
    tile_rows = max(8, min(tile_rows_max, half_rows))
    num_blocks = pl.cdiv(rows, tile_rows)
    rows_padded = num_blocks * tile_rows
    total = rows_padded * LANES

    flat = x.reshape(-1)
    if total != n:                       # pad only when the batch is ragged
        flat = jnp.pad(flat, (0, total - n))
    x2d = flat.reshape(rows_padded, LANES)

    # 2x in + 2x out double buffers + ~6 tile-sized temporaries, with headroom.
    tile_bytes = tile_rows * LANES * 4
    vmem_limit = min(64 << 20, max(16 << 20, 12 * tile_bytes))

    out2d = pl.pallas_call(
        mlp_kernel,
        out_shape=jax.ShapeDtypeStruct((rows_padded, LANES), x.dtype),
        grid=(num_blocks,),
        in_specs=[
            # packed params: whole array, resident in SMEM (scalar reads)
            pl.BlockSpec(memory_space=pltpu.MemorySpace.SMEM),
            # batch tiles: (tile_rows, 128), double-buffered by BlockSpec
            pl.BlockSpec((tile_rows, LANES), lambda i: (i, 0)),
        ],
        out_specs=pl.BlockSpec((tile_rows, LANES), lambda i: (i, 0)),
        compiler_params=pltpu.CompilerParams(
            dimension_semantics=("parallel",),
            vmem_limit_bytes=vmem_limit),
        cost_estimate=pl.CostEstimate(
            flops=88 * total,            # ~16 + 64 + 8 VPU ops per element
            transcendentals=12 * total,  # 12 tanh per element
            bytes_accessed=8 * total),   # 4 B read + 4 B write per element
    )(packed, x2d)

    out_flat = out2d.reshape(-1)
    if total != n:                       # slice only when padding was added
        out_flat = out_flat[:n]
    return out_flat.reshape(n, 1)


def init_params(key):
    """Deterministic init matching nn.Linear's default U(-1/sqrt(in), 1/sqrt(in))."""
    dims = [(1, 8), (8, 4), (4, 1)]
    params = {}
    keys = jax.random.split(key, 2 * len(dims))
    for i, (fan_in, fan_out) in enumerate(dims):
        bound = 1.0 / (fan_in ** 0.5)
        w = jax.random.uniform(keys[2 * i], (fan_in, fan_out),
                               minval=-bound, maxval=bound, dtype=jnp.float32)
        b = jax.random.uniform(keys[2 * i + 1], (1, fan_out),
                               minval=-bound, maxval=bound, dtype=jnp.float32)
        params[f"w{i + 1}"] = w
        params[f"b{i + 1}"] = b
    return params


def reference_forward(x, params):
    h1 = jax.nn.sigmoid(x @ params["w1"] + params["b1"])
    h2 = jax.nn.sigmoid(h1 @ params["w2"] + params["b2"])
    return h2 @ params["w3"] + params["b3"]


if __name__ == "__main__":
    key = jax.random.PRNGKey(0)
    pkey, xkey = jax.random.split(key)
    params = init_params(pkey)

    # Small batch of scalar inputs; deliberately NOT a multiple of 128 so the
    # lane-dense ragged-padding path is exercised, and sized so the grid still
    # has two blocks (one per v7x TensorCore).
    n = 1027
    x = jax.random.normal(xkey, (n, 1), dtype=jnp.float32)

    out = mynet_forward(x, params)
    out = jax.block_until_ready(out)

    ref = reference_forward(x, params)
    assert out.shape == (n, 1), out.shape
    assert jnp.allclose(out, ref, atol=1e-5, rtol=1e-5), (out, ref)

    print("KERNEL_OK")
</pallas_src>

<mosaic_0001>
module attributes {stable_mosaic.version = 11 : i64} {
  func.func @mlp_kernel(%arg0: i32, %arg1: memref<64xf32, #tpu.memory_space<smem>>, %arg2: memref<8x128xf32, #tpu.memory_space<vmem>>, %arg3: memref<8x128xf32, #tpu.memory_space<vmem>>) attributes {dimension_semantics = [#tpu.dimension_semantics<parallel>], iteration_bounds = array<i64: 2>, scalar_prefetch = 0 : i64, scratch_operands = 0 : i64, tpu.core_type = #tpu.core_type<tc>, window_params = [{transform_indices = @transform_0, window_bounds = array<i64: 64>}, {transform_indices = @transform_1, window_bounds = array<i64: 8, 128>}, {transform_indices = @transform_2, window_bounds = array<i64: 8, 128>}]} {
    %c0 = arith.constant 0 : index
    %c0_0 = arith.constant 0 : index
    %0 = vector.load %arg2[%c0, %c0_0] : memref<8x128xf32, #tpu.memory_space<vmem>>, vector<8x128xf32>
    %c48 = arith.constant 48 : index
    %1 = memref.load %arg1[%c48] : memref<64xf32, #tpu.memory_space<smem>>
    %c49 = arith.constant 49 : index
    %2 = memref.load %arg1[%c49] : memref<64xf32, #tpu.memory_space<smem>>
    %c50 = arith.constant 50 : index
    %3 = memref.load %arg1[%c50] : memref<64xf32, #tpu.memory_space<smem>>
    %c51 = arith.constant 51 : index
    %4 = memref.load %arg1[%c51] : memref<64xf32, #tpu.memory_space<smem>>
    %c0_1 = arith.constant 0 : index
    %5 = memref.load %arg1[%c0_1] : memref<64xf32, #tpu.memory_space<smem>>
    %6 = vector.broadcast %5 : f32 to vector<8x128xf32>
    %7 = arith.mulf %0, %6 : vector<8x128xf32>
    %c8 = arith.constant 8 : index
    %8 = memref.load %arg1[%c8] : memref<64xf32, #tpu.memory_space<smem>>
    %9 = vector.broadcast %8 : f32 to vector<8x128xf32>
    %10 = arith.addf %7, %9 : vector<8x128xf32>
    %11 = math.tanh %10 : vector<8x128xf32>
    %c16 = arith.constant 16 : index
    %12 = memref.load %arg1[%c16] : memref<64xf32, #tpu.memory_space<smem>>
    %13 = vector.broadcast %12 : f32 to vector<8x128xf32>
    %14 = arith.mulf %11, %13 : vector<8x128xf32>
    %15 = vector.broadcast %1 : f32 to vector<8x128xf32>
    %16 = arith.addf %15, %14 : vector<8x128xf32>
    %c17 = arith.constant 17 : index
    %17 = memref.load %arg1[%c17] : memref<64xf32, #tpu.memory_space<smem>>
    %18 = vector.broadcast %17 : f32 to vector<8x128xf32>
    %19 = arith.mulf %11, %18 : vector<8x128xf32>
    %20 = vector.broadcast %2 : f32 to vector<8x128xf32>
    %21 = arith.addf %20, %19 : vector<8x128xf32>
    %c18 = arith.constant 18 : index
    %22 = memref.load %arg1[%c18] : memref<64xf32, #tpu.memory_space<smem>>
    %23 = vector.broadcast %22 : f32 to vector<8x128xf32>
    %24 = arith.mulf %11, %23 : vector<8x128xf32>
    %25 = vector.broadcast %3 : f32 to vector<8x128xf32>
    %26 = arith.addf %25, %24 : vector<8x128xf32>
    %c19 = arith.constant 19 : index
    %27 = memref.load %arg1[%c19] : memref<64xf32, #tpu.memory_space<smem>>
    %28 = vector.broadcast %27 : f32 to vector<8x128xf32>
    %29 = arith.mulf %11, %28 : vector<8x128xf32>
    %30 = vector.broadcast %4 : f32 to vector<8x128xf32>
    %31 = arith.addf %30, %29 : vector<8x128xf32>
    %c1 = arith.constant 1 : index
    %32 = memref.load %arg1[%c1] : memref<64xf32, #tpu.memory_space<smem>>
    %33 = vector.broadcast %32 : f32 to vector<8x128xf32>
    %34 = arith.mulf %0, %33 : vector<8x128xf32>
    %c9 = arith.constant 9 : index
    %35 = memref.load %arg1[%c9] : memref<64xf32, #tpu.memory_space<smem>>
    %36 = vector.broadcast %35 : f32 to vector<8x128xf32>
    %37 = arith.addf %34, %36 : vector<8x128xf32>
    %38 = math.tanh %37 : vector<8x128xf32>
    %c20 = arith.constant 20 : index
    %39 = memref.load %arg1[%c20] : memref<64xf32, #tpu.memory_space<smem>>
    %40 = vector.broadcast %39 : f32 to vector<8x128xf32>
    %41 = arith.mulf %38, %40 : vector<8x128xf32>
    %42 = arith.addf %16, %41 : vector<8x128xf32>
    %c21 = arith.constant 21 : index
    %43 = memref.load %arg1[%c21] : memref<64xf32, #tpu.memory_space<smem>>
    %44 = vector.broadcast %43 : f32 to vector<8x128xf32>
    %45 = arith.mulf %38, %44 : vector<8x128xf32>
    %46 = arith.addf %21, %45 : vector<8x128xf32>
    %c22 = arith.constant 22 : index
    %47 = memref.load %arg1[%c22] : memref<64xf32, #tpu.memory_space<smem>>
    %48 = vector.broadcast %47 : f32 to vector<8x128xf32>
    %49 = arith.mulf %38, %48 : vector<8x128xf32>
    %50 = arith.addf %26, %49 : vector<8x128xf32>
    %c23 = arith.constant 23 : index
    %51 = memref.load %arg1[%c23] : memref<64xf32, #tpu.memory_space<smem>>
    %52 = vector.broadcast %51 : f32 to vector<8x128xf32>
    %53 = arith.mulf %38, %52 : vector<8x128xf32>
    %54 = arith.addf %31, %53 : vector<8x128xf32>
    %c2 = arith.constant 2 : index
    %55 = memref.load %arg1[%c2] : memref<64xf32, #tpu.memory_space<smem>>
    %56 = vector.broadcast %55 : f32 to vector<8x128xf32>
    %57 = arith.mulf %0, %56 : vector<8x128xf32>
    %c10 = arith.constant 10 : index
    %58 = memref.load %arg1[%c10] : memref<64xf32, #tpu.memory_space<smem>>
    %59 = vector.broadcast %58 : f32 to vector<8x128xf32>
    %60 = arith.addf %57, %59 : vector<8x128xf32>
    %61 = math.tanh %60 : vector<8x128xf32>
    %c24 = arith.constant 24 : index
    %62 = memref.load %arg1[%c24] : memref<64xf32, #tpu.memory_space<smem>>
    %63 = vector.broadcast %62 : f32 to vector<8x128xf32>
    %64 = arith.mulf %61, %63 : vector<8x128xf32>
    %65 = arith.addf %42, %64 : vector<8x128xf32>
    %c25 = arith.constant 25 : index
    %66 = memref.load %arg1[%c25] : memref<64xf32, #tpu.memory_space<smem>>
    %67 = vector.broadcast %66 : f32 to vector<8x128xf32>
    %68 = arith.mulf %61, %67 : vector<8x128xf32>
    %69 = arith.addf %46, %68 : vector<8x128xf32>
    %c26 = arith.constant 26 : index
    %70 = memref.load %arg1[%c26] : memref<64xf32, #tpu.memory_space<smem>>
    %71 = vector.broadcast %70 : f32 to vector<8x128xf32>
    %72 = arith.mulf %61, %71 : vector<8x128xf32>
    %73 = arith.addf %50, %72 : vector<8x128xf32>
    %c27 = arith.constant 27 : index
    %74 = memref.load %arg1[%c27] : memref<64xf32, #tpu.memory_space<smem>>
    %75 = vector.broadcast %74 : f32 to vector<8x128xf32>
    %76 = arith.mulf %61, %75 : vector<8x128xf32>
    %77 = arith.addf %54, %76 : vector<8x128xf32>
    %c3 = arith.constant 3 : index
    %78 = memref.load %arg1[%c3] : memref<64xf32, #tpu.memory_space<smem>>
    %79 = vector.broadcast %78 : f32 to vector<8x128xf32>
    %80 = arith.mulf %0, %79 : vector<8x128xf32>
    %c11 = arith.constant 11 : index
    %81 = memref.load %arg1[%c11] : memref<64xf32, #tpu.memory_space<smem>>
    %82 = vector.broadcast %81 : f32 to vector<8x128xf32>
    %83 = arith.addf %80, %82 : vector<8x128xf32>
    %84 = math.tanh %83 : vector<8x128xf32>
    %c28 = arith.constant 28 : index
    %85 = memref.load %arg1[%c28] : memref<64xf32, #tpu.memory_space<smem>>
    %86 = vector.broadcast %85 : f32 to vector<8x128xf32>
    %87 = arith.mulf %84, %86 : vector<8x128xf32>
    %88 = arith.addf %65, %87 : vector<8x128xf32>
    %c29 = arith.constant 29 : index
    %89 = memref.load %arg1[%c29] : memref<64xf32, #tpu.memory_space<smem>>
    %90 = vector.broadcast %89 : f32 to vector<8x128xf32>
    %91 = arith.mulf %84, %90 : vector<8x128xf32>
    %92 = arith.addf %69, %91 : vector<8x128xf32>
    %c30 = arith.constant 30 : index
    %93 = memref.load %arg1[%c30] : memref<64xf32, #tpu.memory_space<smem>>
    %94 = vector.broadcast %93 : f32 to vector<8x128xf32>
    %95 = arith.mulf %84, %94 : vector<8x128xf32>
    %96 = arith.addf %73, %95 : vector<8x128xf32>
    %c31 = arith.constant 31 : index
    %97 = memref.load %arg1[%c31] : memref<64xf32, #tpu.memory_space<smem>>
    %98 = vector.broadcast %97 : f32 to vector<8x128xf32>
    %99 = arith.mulf %84, %98 : vector<8x128xf32>
    %100 = arith.addf %77, %99 : vector<8x128xf32>
    %c4 = arith.constant 4 : index
    %101 = memref.load %arg1[%c4] : memref<64xf32, #tpu.memory_space<smem>>
    %102 = vector.broadcast %101 : f32 to vector<8x128xf32>
    %103 = arith.mulf %0, %102 : vector<8x128xf32>
    %c12 = arith.constant 12 : index
    %104 = memref.load %arg1[%c12] : memref<64xf32, #tpu.memory_space<smem>>
    %105 = vector.broadcast %104 : f32 to vector<8x128xf32>
    %106 = arith.addf %103, %105 : vector<8x128xf32>
    %107 = math.tanh %106 : vector<8x128xf32>
    %c32 = arith.constant 32 : index
    %108 = memref.load %arg1[%c32] : memref<64xf32, #tpu.memory_space<smem>>
    %109 = vector.broadcast %108 : f32 to vector<8x128xf32>
    %110 = arith.mulf %107, %109 : vector<8x128xf32>
    %111 = arith.addf %88, %110 : vector<8x128xf32>
    %c33 = arith.constant 33 : index
    %112 = memref.load %arg1[%c33] : memref<64xf32, #tpu.memory_space<smem>>
    %113 = vector.broadcast %112 : f32 to vector<8x128xf32>
    %114 = arith.mulf %107, %113 : vector<8x128xf32>
    %115 = arith.addf %92, %114 : vector<8x128xf32>
    %c34 = arith.constant 34 : index
    %116 = memref.load %arg1[%c34] : memref<64xf32, #tpu.memory_space<smem>>
    %117 = vector.broadcast %116 : f32 to vector<8x128xf32>
    %118 = arith.mulf %107, %117 : vector<8x128xf32>
    %119 = arith.addf %96, %118 : vector<8x128xf32>
    %c35 = arith.constant 35 : index
    %120 = memref.load %arg1[%c35] : memref<64xf32, #tpu.memory_space<smem>>
    %121 = vector.broadcast %120 : f32 to vector<8x128xf32>
    %122 = arith.mulf %107, %121 : vector<8x128xf32>
    %123 = arith.addf %100, %122 : vector<8x128xf32>
    %c5 = arith.constant 5 : index
    %124 = memref.load %arg1[%c5] : memref<64xf32, #tpu.memory_space<smem>>
    %125 = vector.broadcast %124 : f32 to vector<8x128xf32>
    %126 = arith.mulf %0, %125 : vector<8x128xf32>
    %c13 = arith.constant 13 : index
    %127 = memref.load %arg1[%c13] : memref<64xf32, #tpu.memory_space<smem>>
    %128 = vector.broadcast %127 : f32 to vector<8x128xf32>
    %129 = arith.addf %126, %128 : vector<8x128xf32>
    %130 = math.tanh %129 : vector<8x128xf32>
    %c36 = arith.constant 36 : index
    %131 = memref.load %arg1[%c36] : memref<64xf32, #tpu.memory_space<smem>>
    %132 = vector.broadcast %131 : f32 to vector<8x128xf32>
    %133 = arith.mulf %130, %132 : vector<8x128xf32>
    %134 = arith.addf %111, %133 : vector<8x128xf32>
    %c37 = arith.constant 37 : index
    %135 = memref.load %arg1[%c37] : memref<64xf32, #tpu.memory_space<smem>>
    %136 = vector.broadcast %135 : f32 to vector<8x128xf32>
    %137 = arith.mulf %130, %136 : vector<8x128xf32>
    %138 = arith.addf %115, %137 : vector<8x128xf32>
    %c38 = arith.constant 38 : index
    %139 = memref.load %arg1[%c38] : memref<64xf32, #tpu.memory_space<smem>>
    %140 = vector.broadcast %139 : f32 to vector<8x128xf32>
    %141 = arith.mulf %130, %140 : vector<8x128xf32>
    %142 = arith.addf %119, %141 : vector<8x128xf32>
    %c39 = arith.constant 39 : index
    %143 = memref.load %arg1[%c39] : memref<64xf32, #tpu.memory_space<smem>>
    %144 = vector.broadcast %143 : f32 to vector<8x128xf32>
    %145 = arith.mulf %130, %144 : vector<8x128xf32>
    %146 = arith.addf %123, %145 : vector<8x128xf32>
    %c6 = arith.constant 6 : index
    %147 = memref.load %arg1[%c6] : memref<64xf32, #tpu.memory_space<smem>>
    %148 = vector.broadcast %147 : f32 to vector<8x128xf32>
    %149 = arith.mulf %0, %148 : vector<8x128xf32>
    %c14 = arith.constant 14 : index
    %150 = memref.load %arg1[%c14] : memref<64xf32, #tpu.memory_space<smem>>
    %151 = vector.broadcast %150 : f32 to vector<8x128xf32>
    %152 = arith.addf %149, %151 : vector<8x128xf32>
    %153 = math.tanh %152 : vector<8x128xf32>
    %c40 = arith.constant 40 : index
    %154 = memref.load %arg1[%c40] : memref<64xf32, #tpu.memory_space<smem>>
    %155 = vector.broadcast %154 : f32 to vector<8x128xf32>
    %156 = arith.mulf %153, %155 : vector<8x128xf32>
    %157 = arith.addf %134, %156 : vector<8x128xf32>
    %c41 = arith.constant 41 : index
    %158 = memref.load %arg1[%c41] : memref<64xf32, #tpu.memory_space<smem>>
    %159 = vector.broadcast %158 : f32 to vector<8x128xf32>
    %160 = arith.mulf %153, %159 : vector<8x128xf32>
    %161 = arith.addf %138, %160 : vector<8x128xf32>
    %c42 = arith.constant 42 : index
    %162 = memref.load %arg1[%c42] : memref<64xf32, #tpu.memory_space<smem>>
    %163 = vector.broadcast %162 : f32 to vector<8x128xf32>
    %164 = arith.mulf %153, %163 : vector<8x128xf32>
    %165 = arith.addf %142, %164 : vector<8x128xf32>
    %c43 = arith.constant 43 : index
    %166 = memref.load %arg1[%c43] : memref<64xf32, #tpu.memory_space<smem>>
    %167 = vector.broadcast %166 : f32 to vector<8x128xf32>
    %168 = arith.mulf %153, %167 : vector<8x128xf32>
    %169 = arith.addf %146, %168 : vector<8x128xf32>
    %c7 = arith.constant 7 : index
    %170 = memref.load %arg1[%c7] : memref<64xf32, #tpu.memory_space<smem>>
    %171 = vector.broadcast %170 : f32 to vector<8x128xf32>
    %172 = arith.mulf %0, %171 : vector<8x128xf32>
    %c15 = arith.constant 15 : index
    %173 = memref.load %arg1[%c15] : memref<64xf32, #tpu.memory_space<smem>>
    %174 = vector.broadcast %173 : f32 to vector<8x128xf32>
    %175 = arith.addf %172, %174 : vector<8x128xf32>
    %176 = math.tanh %175 : vector<8x128xf32>
    %c44 = arith.constant 44 : index
    %177 = memref.load %arg1[%c44] : memref<64xf32, #tpu.memory_space<smem>>
    %178 = vector.broadcast %177 : f32 to vector<8x128xf32>
    %179 = arith.mulf %176, %178 : vector<8x128xf32>
    %180 = arith.addf %157, %179 : vector<8x128xf32>
    %c45 = arith.constant 45 : index
    %181 = memref.load %arg1[%c45] : memref<64xf32, #tpu.memory_space<smem>>
    %182 = vector.broadcast %181 : f32 to vector<8x128xf32>
    %183 = arith.mulf %176, %182 : vector<8x128xf32>
    %184 = arith.addf %161, %183 : vector<8x128xf32>
    %c46 = arith.constant 46 : index
    %185 = memref.load %arg1[%c46] : memref<64xf32, #tpu.memory_space<smem>>
    %186 = vector.broadcast %185 : f32 to vector<8x128xf32>
    %187 = arith.mulf %176, %186 : vector<8x128xf32>
    %188 = arith.addf %165, %187 : vector<8x128xf32>
    %c47 = arith.constant 47 : index
    %189 = memref.load %arg1[%c47] : memref<64xf32, #tpu.memory_space<smem>>
    %190 = vector.broadcast %189 : f32 to vector<8x128xf32>
    %191 = arith.mulf %176, %190 : vector<8x128xf32>
    %192 = arith.addf %169, %191 : vector<8x128xf32>
    %c56 = arith.constant 56 : index
    %193 = memref.load %arg1[%c56] : memref<64xf32, #tpu.memory_space<smem>>
    %194 = math.tanh %180 : vector<8x128xf32>
    %c52 = arith.constant 52 : index
    %195 = memref.load %arg1[%c52] : memref<64xf32, #tpu.memory_space<smem>>
    %196 = vector.broadcast %195 : f32 to vector<8x128xf32>
    %197 = arith.mulf %194, %196 : vector<8x128xf32>
    %198 = vector.broadcast %193 : f32 to vector<8x128xf32>
    %199 = arith.addf %198, %197 : vector<8x128xf32>
    %200 = math.tanh %184 : vector<8x128xf32>
    %c53 = arith.constant 53 : index
    %201 = memref.load %arg1[%c53] : memref<64xf32, #tpu.memory_space<smem>>
    %202 = vector.broadcast %201 : f32 to vector<8x128xf32>
    %203 = arith.mulf %200, %202 : vector<8x128xf32>
    %204 = arith.addf %199, %203 : vector<8x128xf32>
    %205 = math.tanh %188 : vector<8x128xf32>
    %c54 = arith.constant 54 : index
    %206 = memref.load %arg1[%c54] : memref<64xf32, #tpu.memory_space<smem>>
    %207 = vector.broadcast %206 : f32 to vector<8x128xf32>
    %208 = arith.mulf %205, %207 : vector<8x128xf32>
    %209 = arith.addf %204, %208 : vector<8x128xf32>
    %210 = math.tanh %192 : vector<8x128xf32>
    %c55 = arith.constant 55 : index
    %211 = memref.load %arg1[%c55] : memref<64xf32, #tpu.memory_space<smem>>
    %212 = vector.broadcast %211 : f32 to vector<8x128xf32>
    %213 = arith.mulf %210, %212 : vector<8x128xf32>
    %214 = arith.addf %209, %213 : vector<8x128xf32>
    %c0_2 = arith.constant 0 : index
    %c0_3 = arith.constant 0 : index
    %215 = vector.load %arg3[%c0_2, %c0_3] : memref<8x128xf32, #tpu.memory_space<vmem>>, vector<8x128xf32>
    tpu.vector_store %arg3[%c0_2, %c0_3], %214 {strides = array<i32>} : memref<8x128xf32, #tpu.memory_space<vmem>>, vector<8x128xf32>,
    return
  }
  func.func @transform_0(%arg0: i32) -> i32 {
    %c0_i32 = arith.constant 0 : i32
    %c0_i32_0 = arith.constant 0 : i32
    return %c0_i32 : i32
  }
  func.func @transform_1(%arg0: i32) -> (i32, i32) {
    %c0_i32 = arith.constant 0 : i32
    %c0_i32_0 = arith.constant 0 : i32
    return %arg0, %c0_i32 : i32, i32
  }
  func.func @transform_2(%arg0: i32) -> (i32, i32) {
    %c0_i32 = arith.constant 0 : i32
    %c0_i32_0 = arith.constant 0 : i32
    return %arg0, %c0_i32 : i32, i32
  }
}

</mosaic_0001>

<bundles_post_ra>
// kernel: tpu_custom_call.1
= control target key start
LH: loop header
LB: loop body
LE: loop exit
PB: predicated region body
PF: predicated region fallthrough
CT: control target
= control target key end

     0   :  { %s1115_s0 = inlined_call_operand.hbm [shape: f32[64], index: 0, kind: input, shape index: {}]   ;;  %s1116_s1 = inlined_call_operand.hbm [shape: f32[16,128], index: 1, kind: input, shape index: {}]   ;;  %s1117_s2 = inlined_call_operand.hbm [shape: f32[16,128], index: 2, kind: output, shape index: {}]  }
   0x1   :  { %1122 = sst [smem:[#allocation11_spill]] %s1115_s0 }
   0x2   :  { %1123 = sst [smem:[#allocation12_spill]] %s1116_s1 }
   0x3   :  { %7 = vsyncpa [#allocation5], 0 }
   0x4   :  { %8 = vsyncpa [#allocation3], 0 }
   0x5   :  { %10 = vsyncpa [#allocation3 + $0x1], 0 }
   0x6   :  { %11 = vsyncpa [#allocation4], 0 }
   0x7   :  { %13 = vsyncpa [#allocation4 + $0x1], 0  ;;  %s767_s9 = smov 0   ;;  %s769_s10 = smov 0  }
   0x8   :  { %s771_s11 = smov 0   ;;  %s773_s12 = smov 0  }
   0x9 LB: > { %s788_s13 = sadd.s32 4294967295, %s747_s12   ;;  %s483_s14 = sadd.s32 4294967294, %s747_s12   ;;  %s747_s12 = sphi %s773_s12, %s1144_s12   ;;  %s743_s11 = sphi %s771_s11, %s1143_s11   ;;  %s739_s10 = sphi %s769_s10, %s1142_s10   ;;  %s735_s9 = sphi %s767_s9, %s1141_s9  }
   0xa   : > { %p60_p0 = scmp.ne.s32.totalorder %s739_s10, %s735_s9  ;;  %p1118_p1 = scmp.eq.s32.totalorder %s788_s13, 0 }
   0xb   : > { %p90_p3 = scmp.eq.s32.totalorder %s483_s14, 1  ;;  %p484_p5 = scmp.ge.s32.totalorder %s747_s12, 1 }
   0xc   : > { %p797_p4 = por %p1118_p1, %p60_p0  ;;  %p97_p7 = scmp.lt.s32.totalorder %s747_s12, 3 }
   0xd   : > { %p802_p6 = por %p90_p3, %p60_p0  ;;  %s813_s18 = sadd.s32 1, %s747_s12  }
   0xe   : > { %s1124_s15 = scalar_select %p797_p4, 1, 0 }
   0xf   : > { %s1125_s16 = scalar_select %p802_p6, 1, 0 }
  0x10   : > { %p807_p8 = pnand %p484_p5, %p97_p7  ;;  %s44_s19 = ssub.s32 %s747_s12, %s813_s18 }
  0x11   : > { %s47_s20 = sadd.s32 1, %s743_s11  ;;  %p826_p12 = scmp.eq.s32.totalorder %s44_s19, 0 }
  0x12   : > { %p561_p10 = pneg %p807_p8  ;;  %p54_p13 = scmp.ne.s32.totalorder %s743_s11, %s739_s10 }
  0x13   : > { %p55_p0 = scmp.eq.s32.totalorder %s747_s12, 0  ;;  %p574_p3 = scmp.lt.s32.totalorder %s747_s12, 2 }
  0x14   : > { %p822_p11 = pnand %p561_p10, %p1118_p1  ;;  %s1129_s0 = sld [smem:[#allocation11_spill]] }
  0x16   : > { %p636_p7 = pneg %p822_p11 }
  0x1a   : > { %s634_s25 = scalar_lea.hbm %s1129_s0, 16 }
  0x1b   : > { %p635_p5 = scmp.ne.s32.totalorder %s1129_s0, %s634_s25  ;;  %p641_p1 = scmp.lt.u32.totalorder %s634_s25, %s1129_s0 }
  0x1d   : > { %p637_p10 = pnand %p636_p7, %p635_p5 }
  0x1f   : > { %p638_p9 = pneg %p637_p10 }
  0x21   : > { %p643_p2 = pnand %p641_p1, %p638_p9 }
  0x23   : > { %646 = shalt.err (!%p643_p2)
}
  0x24   : > { %s749_s30 = smov [#allocation2]   ;;  %p56_p1 = por %p55_p0, %p54_p13 }
  0x25   : > { %564 = dma.hbm_to_smem (!%p822_p11), %s1129_s0, 16, %s749_s30, [#allocation5]  }
  0x26   : > { %s853_s5 = scalar_select %p826_p12, %s743_s11, %s47_s20  }
  0x27   : > { %p1130_p2 = scmp.eq.s32.totalorder %s788_s13, 1  ;;  %s119_s7 = sand.u32 1, %s743_s11  }
  0x28   : > { %s488_s8 = sshll.u32 %s747_s12, 7  ;;  %s487_s14 = sshll.u32 %s119_s7, 3 }
  0x29   : > { %p865_p9 = por %p1130_p2, %p54_p13  ;;  %s1132_s1 = sld [smem:[#allocation12_spill]] }
  0x2a   : > { %s123_s20 = scalar_lea.vmem [#allocation6], %s487_s14  ;;  %p878_p11 = pnand %p574_p3, %p56_p1 }
  0x2b   : > { %s1131_s6 = scalar_select %p865_p9, 1, 0 }
  0x2c   : > { %s130_s22 = sshll.u32 %s123_s20, 4  ;;  %s120_s25 = scalar_lea.sflag [#allocation3], %s119_s7  ;;  %s882_s22 = int_to_ptr.vmem [resolvable:$true] %s130_s22 }
  0x2d   : > { %p649_p13 = pneg %p878_p11 }
  0x2f   : > { %s874_s23 = scalar_lea.hbm %s1132_s1, %s488_s8  ;;  %s652_s29 = scalar_lea.hbm %s1132_s1, 256 }
  0x30   : > { %s647_s26 = scalar_lea.hbm %s874_s23, 128  ;;  %p653_p3 = scmp.lt.u32.totalorder %s874_s23, %s1132_s1 }
  0x31   : > { %p648_p12 = scmp.ne.s32.totalorder %s874_s23, %s647_s26  ;;  %p654_p7 = scmp.lt.u32.totalorder %s652_s29, %s647_s26 }
  0x32   : > { %p656_p1 = scmp.lt.u32.totalorder %s647_s26, %s874_s23 }
  0x33   : > { %p650_p0 = pnand %p649_p13, %p648_p12  ;;  %p655_p10 = por %p654_p7, %p653_p3 }
  0x35   : > { %p651_p5 = pneg %p650_p0  ;;  %p657_p2 = por %p656_p1, %p655_p10 }
  0x37   : > { %p658_p6 = pnand %p657_p2, %p651_p5 }
  0x39   : > { %661 = shalt.err (!%p658_p6)
}
  0x3a   : > { %s662_s4 = scalar_lea.vmem %s882_s22, 128  ;;  %s750_s7 = smov [#allocation6]  }
  0x3b   : > { %p663_p12 = scmp.ne.s32.totalorder %s882_s22, %s662_s4  ;;  %s667_s8 = sshll.u32 %s750_s7, 4  ;;  %s668_s8 = int_to_ptr.vmem [resolvable:$false] %s667_s8 }
  0x3c   : > { %s669_s14 = scalar_lea.vmem %s668_s8, 256  ;;  %p670_p4 = scmp.lt.s32.totalorder %s882_s22, %s668_s8 }
  0x3d   : > { %p665_p0 = pnand %p663_p12, %p649_p13  ;;  %p671_p3 = scmp.lt.s32.totalorder %s669_s14, %s662_s4 }
  0x3f   : > { %p666_p9 = pneg %p665_p0  ;;  %p672_p7 = por %p671_p3, %p670_p4 }
  0x41   : > { %p673_p10 = pnand %p672_p7, %p666_p9 }
  0x43   : > { %676 = shalt.err (!%p673_p10)
}
  0x44   : > { %568 = dma.hbm_to_vmem [thread:$0]  (!%p878_p11), %s874_s23, 128, %s882_s22, %s120_s25  }
  0x45   : > { %139 = sbr.rel (%p807_p8) target bundleno = 169 (0xa9), region = 28  ;;  %p1134_p6 = scmp.eq.s32.totalorder (!%p807_p8), %s788_s13, 0 }
  0x4c   : > { %722 = dma.done.wait (%p1134_p6), [#allocation5], 16   ;;  %p1135_p13 = pmov %p1134_p6 }
  0x4d   : > { %s916_s19 = sand.u32 1, %s739_s10   ;;  %p1136_p4 = scmp.ne.s32.totalorder %s1124_s15, 0 }
  0x4e   : > { %724 = vsyncadd (%p1135_p13), [#allocation5], 4294967280  ;;  %s1121_s21 = sshll.u32 %s916_s19, 3  ;;  %s146_s20 = scalar_lea.sflag [#allocation3], %s916_s19 }
  0x4f   : > { %s149_s23 = scalar_lea.vmem [#allocation6], %s1121_s21 }
  0x50   : > { %726 = dma.done.wait (%p1136_p4), %s146_s20, 128  }
  0x51   : > { %728 = vsyncadd (%p1136_p4), %s146_s20, 4294967168 }
  0x52   : > { %154 = sfence }
  0x53   : > { %s176_s17 = sld [smem:[#allocation2]]  ;;  %s502_s24 = sld [smem:[#allocation2 + $0x1]]  ;;  %v926_v0 = vld [vmem:[%s149_s23] sm:$0xff] }
  0x54   : > { %s497_s22 = sld [smem:[#allocation2 + $0x8]]  ;;  %s503_s25 = sld [smem:[#allocation2 + $0x9]] }
  0x55   : > { %s508_s26 = sld [smem:[#allocation2 + $0x2]]  ;;  %s928_s27 = sld [smem:[#allocation2 + $0x30]] }
  0x56   : > { %s509_s28 = sld [smem:[#allocation2 + $0xa]]  ;;  %s931_s29 = sld [smem:[#allocation2 + $0x31]] }
  0x57   : > { %s933_s30 = sld [smem:[#allocation2 + $0x32]]  ;;  %s935_s15 = sld [smem:[#allocation2 + $0x33]] }
  0x58   : > { %s514_s3 = sld [smem:[#allocation2 + $0x3]]  ;;  %s937_s4 = sld [smem:[#allocation2 + $0x10]] }
  0x59   : > { %v177_v1 = vstv %s176_s17  ;;  %v204_v5 = vstv %s502_s24  ;;  %s515_s7 = sld [smem:[#allocation2 + $0xb]]  ;;  %s940_s8 = sld [smem:[#allocation2 + $0x11]] }
  0x5a   : > { %v178_v2 = vmul.f32 %v177_v1, %v926_v0  ;;  %v180_v3 = vstv %s497_s22  ;;  %v205_v6 = vmul.f32 %v204_v5, %v926_v0  ;;  %v207_v7 = vstv %s503_s25  ;;  %s942_s14 = sld [smem:[#allocation2 + $0x12]]  ;;  %s944_s20 = sld [smem:[#allocation2 + $0x13]] }
  0x5b   : > { %v227_v9 = vstv %s508_s26  ;;  %s520_s23 = sld [smem:[#allocation2 + $0x4]]  ;;  %s951_s24 = sld [smem:[#allocation2 + $0x15]]  ;;  %v186_v17 = vstv %s928_s27 }
  0x5c   : > { %v181_v4 = vadd.f32 %v180_v3, %v178_v2  ;;  %v208_v8 = vadd.f32 %v207_v7, %v205_v6  ;;  %s946_s17 = sld [smem:[#allocation2 + $0x14]]  ;;  %v228_v10 = vmul.f32 %v227_v9, %v926_v0  ;;  %v230_v11 = vstv %s509_s28  ;;  %s953_s25 = sld [smem:[#allocation2 + $0x16]] }
  0x5d   : > { %s949_s22 = sld [smem:[#allocation2 + $0xc]]  ;;  %s955_s26 = sld [smem:[#allocation2 + $0x5]]  ;;  %v191_v24 = vstv %s931_s29  ;;  %v196_v25 = vstv %s933_s30  ;;  %v201_v28 = vstv %s935_s15 }
  0x5e   : > { %610 = vtanh.f32 %v181_v4  ;;  %v231_v12 = vadd.f32 %v230_v11, %v228_v10  ;;  %v250_v13 = vstv %s514_s3  ;;  %s957_s21 = sld [smem:[#allocation2 + $0x17]]  ;;  %s960_s28 = sld [smem:[#allocation2 + $0xd]]  ;;  %v184_v16 = vstv %s937_s4 }
  0x5f   : > { %612 = vtanh.f32 %v208_v8  ;;  %v251_v14 = vmul.f32 %v250_v13, %v926_v0  ;;  %v253_v15 = vstv %s515_s7  ;;  %s962_s0 = sld [smem:[#allocation2 + $0x18]]  ;;  %s964_s1 = sld [smem:[#allocation2 + $0x19]]  ;;  %v189_v20 = vstv %s940_s8 }
  0x60   : > { %614 = vtanh.f32 %v231_v12  ;;  %v194_v21 = vstv %s942_s14  ;;  %s970_s3 = sld [smem:[#allocation2 + $0x1a]]  ;;  %v199_v26 = vstv %s944_s20  ;;  %s977_s7 = sld [smem:[#allocation2 + $0x1b]] }
  0x61   : > { %v254_v18 = vadd.f32 %v253_v15, %v251_v14  ;;  %v273_v19 = vstv %s520_s23  ;;  %s979_s27 = sld [smem:[#allocation2 + $0x1c]]  ;;  %s983_s4 = sld [smem:[#allocation2 + $0x1d]]  ;;  %v215_v35 = vstv %s951_s24 }
  0x62   : > { %v274_v22 = vmul.f32 %v273_v19, %v926_v0  ;;  %v211_v29 = vstv %s946_s17  ;;  %s986_s8 = sld [smem:[#allocation2 + $0x6]]  ;;  %s991_s30 = sld [smem:[#allocation2 + $0x1f]]  ;;  %v219_v37 = vstv %s953_s25 }
  0x63   : > { %v276_v23 = vstv %s949_s22  ;;  %616 = vtanh.f32 %v254_v18  ;;  %v296_v31 = vstv %s955_s26  ;;  %s989_s29 = sld [smem:[#allocation2 + $0x1e]]  ;;  %s1001_s14 = sld [smem:[#allocation2 + $0x20]] }
  0x64   : > { %v277_v30 = vadd.f32 %v276_v23, %v274_v22  ;;  %v297_v38 = vmul.f32 %v296_v31, %v926_v0  ;;  %v299_v39 = vstv %s960_s28  ;;  %s996_s15 = sld [smem:[#allocation2 + $0xe]]  ;;  %v223_v43 = vstv %s957_s21  ;;  %s1003_s20 = sld [smem:[#allocation2 + $0x21]] }
  0x65   : > { %v234_v46 = vstv %s962_s0  ;;  %v238_v47 = vstv %s964_s1  ;;  %s1005_s23 = sld [smem:[#allocation2 + $0x22]]  ;;  %s1008_s0 = sld [smem:[#allocation2 + $0x7]] }
  0x66   : > { %618 = vtanh.f32 %v277_v30  ;;  %v300_v50 = vadd.f32 %v299_v39, %v297_v38  ;;  %v242_v55 = vstv %s970_s3  ;;  %v246_v59 = vstv %s977_s7  ;;  %s1011_s1 = sld [smem:[#allocation2 + $0x23]]  ;;  %s1013_s21 = sld [smem:[#allocation2 + $0xf]] }
  0x67   : > { %v257_v60 = vstv %s979_s27  ;;  %v261_v61 = vstv %s983_s4  ;;  %s1020_s17 = sld [smem:[#allocation2 + $0x24]]  ;;  %s1022_s22 = sld [smem:[#allocation2 + $0x25]] }
  0x68   : > { %v611_v27 = vpop.eup %610  ;;  %620 = vtanh.f32 %v300_v50  ;;  %v319_v62 = vstv %s986_s8  ;;  %v269_v4 = vstv %s991_s30  ;;  %s1024_s24 = sld [smem:[#allocation2 + $0x26]]  ;;  %s1027_s25 = sld [smem:[#allocation2 + $0x27]] }
  0x69   : > { %v185_v32 = vmul.f32 %v611_v27, %v184_v16  ;;  %v190_v33 = vmul.f32 %v611_v27, %v189_v20  ;;  %v195_v34 = vmul.f32 %v611_v27, %v194_v21  ;;  %v200_v36 = vmul.f32 %v611_v27, %v199_v26  ;;  %v613_v40 = vpop.eup %612  ;;  %s1035_s26 = sld [smem:[#allocation2 + $0x28]]  ;;  %s1037_s28 = sld [smem:[#allocation2 + $0x29]] }
  0x6a   : > { %v212_v44 = vmul.f32 %v613_v40, %v211_v29  ;;  %v216_v45 = vmul.f32 %v613_v40, %v215_v35  ;;  %v220_v49 = vmul.f32 %v613_v40, %v219_v37  ;;  %v615_v51 = vpop.eup %614  ;;  %v224_v54 = vmul.f32 %v613_v40, %v223_v43  ;;  %s1040_s3 = sld [smem:[#allocation2 + $0x2a]]  ;;  %s1042_s7 = sld [smem:[#allocation2 + $0x2b]] }
  0x6b   : > { %v187_v41 = vadd.f32 %v186_v17, %v185_v32  ;;  %v192_v42 = vadd.f32 %v191_v24, %v190_v33  ;;  %v197_v48 = vadd.f32 %v196_v25, %v195_v34  ;;  %v202_v52 = vadd.f32 %v201_v28, %v200_v36  ;;  %s1049_s27 = sld [smem:[#allocation2 + $0x2c]]  ;;  %s1051_s4 = sld [smem:[#allocation2 + $0x2d]] }
  0x6c   : > { %v235_v57 = vmul.f32 %v615_v51, %v234_v46  ;;  %v239_v58 = vmul.f32 %v615_v51, %v238_v47  ;;  %v243_v2 = vmul.f32 %v615_v51, %v242_v55  ;;  %v265_v3 = vstv %s989_s29  ;;  %s1053_s8 = sld [smem:[#allocation2 + $0x2e]]  ;;  %s1055_s29 = sld [smem:[#allocation2 + $0x2f]] }
  0x6d   : > { %v213_v53 = vadd.f32 %v212_v44, %v187_v41  ;;  %v217_v56 = vadd.f32 %v216_v45, %v192_v42  ;;  %v617_v63 = vpop.eup %616  ;;  %v221_v1 = vadd.f32 %v220_v49, %v197_v48  ;;  %v225_v5 = vadd.f32 %v224_v54, %v202_v52  ;;  %s545_s30 = sld [smem:[#allocation2 + $0x34]]  ;;  %p1138_p9 = scmp.ne.s32.totalorder %s1131_s6, 0 }
  0x6e   : > { %v247_v7 = vmul.f32 %v615_v51, %v246_v59  ;;  %v322_v8 = vstv %s996_s15  ;;  %v258_v10 = vmul.f32 %v617_v63, %v257_v60  ;;  %v262_v11 = vmul.f32 %v617_v63, %v261_v61  ;;  %s546_s15 = sld [smem:[#allocation2 + $0x35]] }
  0x6f   : > { %v236_v6 = vadd.f32 %v235_v57, %v213_v53  ;;  %v240_v9 = vadd.f32 %v239_v58, %v217_v56  ;;  %v320_v12 = vmul.f32 %v319_v62, %v926_v0  ;;  %v280_v13 = vstv %s1001_s14  ;;  %s544_s14 = sld [smem:[#allocation2 + $0x38]] }
  0x70   : > { %v619_v14 = vpop.eup %618  ;;  %v244_v15 = vadd.f32 %v243_v2, %v221_v1  ;;  %v266_v16 = vmul.f32 %v617_v63, %v265_v3  ;;  %v284_v17 = vstv %s1003_s20  ;;  %v288_v18 = vstv %s1005_s23  ;;  %s547_s20 = sld [smem:[#allocation2 + $0x36]]  ;;  %s548_s23 = sld [smem:[#allocation2 + $0x37]] }
  0x71   : > { %v248_v19 = vadd.f32 %v247_v7, %v225_v5  ;;  %v270_v20 = vmul.f32 %v617_v63, %v269_v4  ;;  %v323_v21 = vadd.f32 %v322_v8, %v320_v12  ;;  %v342_v22 = vstv %s1008_s0  ;;  %s550_s0 = sshll.u32 %s788_s13, 7  ;;  %s751_s13 = smov [#allocation7]  }
  0x72   : > { %v259_v23 = vadd.f32 %v258_v10, %v236_v6  ;;  %v263_v24 = vadd.f32 %v262_v11, %v240_v9  ;;  %v292_v25 = vstv %s1011_s1  ;;  %v345_v26 = vstv %s1013_s21  ;;  %v621_v34 = vpop.eup %620  ;;  %s1137_s1 = sshll.u32 %s916_s19, 3 }
  0x73   : > { %v281_v27 = vmul.f32 %v619_v14, %v280_v13  ;;  %v285_v28 = vmul.f32 %v619_v14, %v284_v17  ;;  %622 = vtanh.f32 %v323_v21  ;;  %v343_v29 = vmul.f32 %v342_v22, %v926_v0  ;;  %s170_s21 = scalar_lea.vmem [#allocation7], %s1137_s1 }
  0x74   : > { %v267_v30 = vadd.f32 %v266_v16, %v244_v15  ;;  %v289_v31 = vmul.f32 %v619_v14, %v288_v18  ;;  %v303_v32 = vstv %s1020_s17  ;;  %v307_v33 = vstv %s1022_s22  ;;  %s401_s17 = sshll.u32 %s170_s21, 4  ;;  %s1073_s17 = int_to_ptr.vmem [resolvable:$true] %s401_s17 }
  0x75   : > { %v271_v35 = vadd.f32 %v270_v20, %v248_v19  ;;  %v293_v36 = vmul.f32 %v619_v14, %v292_v25  ;;  %v311_v37 = vstv %s1024_s24  ;;  %v346_v38 = vadd.f32 %v345_v26, %v343_v29 }
  0x76   : > { %v315_v39 = vstv %s1027_s25  ;;  %v282_v40 = vadd.f32 %v281_v27, %v259_v23  ;;  %v286_v0 = vadd.f32 %v285_v28, %v263_v24  ;;  %v290_v41 = vadd.f32 %v289_v31, %v267_v30  ;;  %s1071_s25 = scalar_lea.hbm %s1117_s2, %s550_s0 }
  0x77   : > { %624 = vtanh.f32 %v346_v38  ;;  %v304_v42 = vmul.f32 %v621_v34, %v303_v32  ;;  %v308_v43 = vmul.f32 %v621_v34, %v307_v33  ;;  %v312_v44 = vmul.f32 %v621_v34, %v311_v37 }
  0x78   : > { %v294_v45 = vadd.f32 %v293_v36, %v271_v35  ;;  %v316_v46 = vmul.f32 %v621_v34, %v315_v39  ;;  %v326_v47 = vstv %s1035_s26  ;;  %v330_v48 = vstv %s1037_s28  ;;  %s388_s26 = scalar_lea.sflag [#allocation4], %s916_s19  ;;  %s677_s28 = scalar_lea.vmem %s1073_s17, 128 }
  0x79   : > { %v334_v49 = vstv %s1040_s3  ;;  %v338_v50 = vstv %s1042_s7  ;;  %v305_v51 = vadd.f32 %v304_v42, %v282_v40  ;;  %v309_v52 = vadd.f32 %v308_v43, %v286_v0  ;;  %p678_p8 = scmp.ne.s32.totalorder %s1073_s17, %s677_s28  ;;  %s681_s3 = sshll.u32 %s751_s13, 4  ;;  %s682_s3 = int_to_ptr.vmem [resolvable:$false] %s681_s3 }
  0x7a   : > { %v313_v53 = vadd.f32 %v312_v44, %v290_v41  ;;  %v317_v55 = vadd.f32 %v316_v46, %v294_v45  ;;  %v349_v60 = vstv %s1049_s27  ;;  %v353_v61 = vstv %s1051_s4  ;;  %s683_s7 = scalar_lea.vmem %s682_s3, 256  ;;  %p684_p1 = scmp.lt.s32.totalorder %s1073_s17, %s682_s3 }
  0x7b   : > { %v357_v62 = vstv %s1053_s8  ;;  %v361_v63 = vstv %s1055_s29  ;;  %v367_v14 = vstv %s545_s30  ;;  %v373_v15 = vstv %s546_s15  ;;  %p679_p11 = pnand %p678_p8, %p1138_p9  ;;  %p685_p2 = scmp.lt.s32.totalorder %s683_s7, %s677_s28 }
  0x7c   : > { %v369_v17 = vstv %s544_s14  ;;  %v378_v18 = vstv %s547_s20  ;;  %v383_v23 = vstv %s548_s23 }
  0x7d   : > { %v623_v54 = vpop.eup %622  ;;  %p680_p5 = pneg %p679_p11  ;;  %p686_p12 = por %p685_p2, %p684_p1 }
  0x7e   : > { %v327_v56 = vmul.f32 %v623_v54, %v326_v47  ;;  %v331_v57 = vmul.f32 %v623_v54, %v330_v48  ;;  %v335_v58 = vmul.f32 %v623_v54, %v334_v49  ;;  %v339_v59 = vmul.f32 %v623_v54, %v338_v50 }
  0x7f   : > { %p687_p0 = pnand %p686_p12, %p680_p5 }
  0x80   : > { %v328_v1 = vadd.f32 %v327_v56, %v305_v51  ;;  %v332_v2 = vadd.f32 %v331_v57, %v309_v52  ;;  %v336_v3 = vadd.f32 %v335_v58, %v313_v53  ;;  %v340_v5 = vadd.f32 %v339_v59, %v317_v55 }
  0x81   : > { %v625_v4 = vpop.eup %624 }
  0x82   : > { %v350_v6 = vmul.f32 %v625_v4, %v349_v60  ;;  %v354_v7 = vmul.f32 %v625_v4, %v353_v61  ;;  %v358_v8 = vmul.f32 %v625_v4, %v357_v62  ;;  %v362_v9 = vmul.f32 %v625_v4, %v361_v63 }
  0x84   : > { %v351_v10 = vadd.f32 %v350_v6, %v328_v1  ;;  %v355_v11 = vadd.f32 %v354_v7, %v332_v2  ;;  %v359_v12 = vadd.f32 %v358_v8, %v336_v3  ;;  %v363_v13 = vadd.f32 %v362_v9, %v340_v5 }
  0x86   : > { %626 = vtanh.f32 %v351_v10 }
  0x87   : > { %628 = vtanh.f32 %v355_v11 }
  0x88   : > { %630 = vtanh.f32 %v359_v12 }
  0x89   : > { %632 = vtanh.f32 %v363_v13 }
  0x90   : > { %v627_v16 = vpop.eup %626 }
  0x91   : > { %v629_v19 = vpop.eup %628  ;;  %v368_v20 = vmul.f32 %v627_v16, %v367_v14 }
  0x92   : > { %v631_v21 = vpop.eup %630  ;;  %v374_v22 = vmul.f32 %v629_v19, %v373_v15 }
  0x93   : > { %v633_v24 = vpop.eup %632  ;;  %v370_v25 = vadd.f32 %v369_v17, %v368_v20  ;;  %v379_v26 = vmul.f32 %v631_v21, %v378_v18 }
  0x94   : > { %v384_v28 = vmul.f32 %v633_v24, %v383_v23 }
  0x95   : > { %v375_v27 = vadd.f32 %v374_v22, %v370_v25 }
  0x97   : > { %v380_v29 = vadd.f32 %v379_v26, %v375_v27 }
  0x99   : > { %v385_v30 = vadd.f32 %v384_v28, %v380_v29 }
  0x9b   : > { %386 = vst [vmem:[%s170_s21] sm:$0xff] %v385_v30 }
  0x9c   : > { %690 = shalt.err (!%p687_p0)
}
  0x9d   : > { %s691_s19 = scalar_lea.hbm %s1071_s25, 128  ;;  %s695_s8 = scalar_lea.hbm %s1117_s2, 256 }
  0x9e   : > { %p692_p3 = scmp.ne.s32.totalorder %s1071_s25, %s691_s19  ;;  %p696_p6 = scmp.lt.u32.totalorder %s1071_s25, %s1117_s2 }
  0x9f   : > { %p697_p13 = scmp.lt.u32.totalorder %s695_s8, %s691_s19  ;;  %p699_p8 = scmp.lt.u32.totalorder %s691_s19, %s1071_s25 }
  0xa0   : > { %p693_p7 = pnand %p692_p3, %p1138_p9 }
  0xa1   : > { %p698_p4 = por %p697_p13, %p696_p6 }
  0xa2   : > { %p694_p10 = pneg %p693_p7 }
  0xa3   : > { %p700_p11 = por %p699_p8, %p698_p4 }
  0xa5   : > { %p701_p5 = pnand %p700_p11, %p694_p10 }
  0xa7   : > { %704 = shalt.err (!%p701_p5)
}
  0xa8   : > { %559 = dma.vmem_to_hbm [thread:$0]  (%p1138_p9), %s1073_s17, 128, %s1071_s25, %s388_s26  }
  0xa9 PF: > { %s413_s15 = sand.u32 1, %s735_s9   ;;  %p1139_p1 = scmp.ne.s32.totalorder %s1125_s16, 0 }
  0xaa   : > { %p1140_p2 = scmp.ge.s32.totalorder %s747_s12, 2  ;;  %s414_s14 = scalar_lea.sflag [#allocation4], %s413_s15 }
  0xac   : > { %p570_p12 = pnand %p1140_p2, %p1139_p1 }
  0xae   : > { %730 = dma.done.wait (!%p570_p12), %s414_s14, 128  }
  0xaf   : > { %732 = vsyncadd (!%p570_p12), %s414_s14, 4294967168  ;;  %p16_p0 = scmp.ge.s32.totalorder %s813_s18, 4   ;;  %s1141_s9 = smov %s739_s10 }
  0xb0   : > { %s1142_s10 = smov %s743_s11  ;;  %s1143_s11 = smov %s853_s5 }
  0xb1   : > { %s1144_s12 = smov %s813_s18  ;;  %18 = sbr.rel (!%p16_p0) target bundleno = 9 (0x9), region = 78 }
  0xb8   :  { %419 = vsyncpa [#allocation3], 1 }
  0xb9   :  { %421 = vsyncpa [#allocation3 + $0x1], 1 }
  0xba   :  { %422 = vsyncpa [#allocation4], 1 }
  0xbb   :  { %424 = vsyncpa [#allocation4 + $0x1], 1 }
  0xbc   :  { %425 = vsyncpa [#allocation5], 1 }
  0xbd   :  { %427 = vsyncpa [#allocation5 + $0x1], 1 }

</bundles_post_ra>
